<compile_context>
chip_gen: v5e
topology: v5e:2x2
jax: 0.10.0
libtpu: 0.0.40
codegen_flags: <defaults>
</compile_context>

<pallas_src>
import functools

import jax
import jax.numpy as jnp
from jax import lax
from jax.experimental import pallas as pl
from jax.experimental.pallas import tpu as pltpu


# ----------------------------- Pallas kernel --------------------------------

def _shift_groups(a, row_w, m_r, m_l):
    """ShiftConv2d1's depthwise 5x5 shift on a (C, S) channels-first slab.

    S = H * row_w is the flattened spatial axis (rows of width row_w).
    Channel groups of size g = C // 5 are shifted by +/-2 along W or H with
    zero fill.  m_r / m_l ((1, S), values in {0, 1}) zero the within-row
    padding positions of the two W shifts; the H shifts move whole rows by
    2*row_w, so their zero fill from the concat is already exact.
    """
    C, S = a.shape
    g = C // 5
    zc = jnp.zeros((g, 2), a.dtype)
    # group 0: out(h, w) = a(h, w + 2)
    s_r = jnp.concatenate([a[0 * g:1 * g, 2:], zc], axis=1) * m_r
    # group 1: out(h, w) = a(h, w - 2)
    s_l = jnp.concatenate([zc, a[1 * g:2 * g, :S - 2]], axis=1) * m_l
    # groups 2/3: out(h, w) = a(h +/- 2, w)
    if 2 * row_w < S:
        zr = jnp.zeros((g, 2 * row_w), a.dtype)
        s_d = jnp.concatenate([a[2 * g:3 * g, 2 * row_w:], zr], axis=1)
        s_u = jnp.concatenate([zr, a[3 * g:4 * g, :S - 2 * row_w]], axis=1)
    else:  # fewer than 3 rows: the +/-2 row shift only ever sees zero padding
        s_d = jnp.zeros((g, S), a.dtype)
        s_u = jnp.zeros((g, S), a.dtype)
    # group 4 (plus any remainder channels): identity
    return jnp.concatenate([s_r, s_l, s_d, s_u, a[4 * g:]], axis=0)


def scm_kernel(x_ref, w1_ref, b1_ref, w2_ref, b2_ref, mr_ref, ml_ref, o_ref,
               *, row_w):
    m_r = mr_ref[...]                                            # (1, S) bf16
    m_l = ml_ref[...]

    # conv0: shift + 1x1 conv (bf16 MXU matmul, f32 accumulate) + bias, ReLU
    xs = _shift_groups(x_ref[...], row_w, m_r, m_l)              # (Cin, S) bf16
    h = jnp.dot(w1_ref[...], xs, preferred_element_type=jnp.float32)
    h = jnp.maximum(h + b1_ref[...], 0.0)                        # f32 (Chid, S)

    # conv1: shift + 1x1 conv + bias (Chid groups are 16-channel -> bf16
    # sublane-tile aligned slices on the second shift)
    hs = _shift_groups(h.astype(jnp.bfloat16), row_w, m_r, m_l)  # (Chid, S)
    y = jnp.dot(w2_ref[...], hs, preferred_element_type=jnp.float32)
    o_ref[...] = (y + b2_ref[...]).astype(o_ref.dtype)           # lane-dense store


# ------------------------------ JAX wrapper ----------------------------------

def scm_forward(x, w1, b1, w2, b2):
    """x: (B, n, N, C).  w1: (Chid, Cin), b1: (Chid,), w2: (Cout, Chid), b2: (Cout,)."""
    B, n, N, C = x.shape
    Cin = n * C
    Chid, Cout = w1.shape[0], w2.shape[0]
    assert w1.shape[1] == Cin and w2.shape[1] == Chid
    assert Cout == Cin, "SCM's trailing reshape requires out_channels == n * C"
    S = B * N

    # torch glue: x.reshape(B, n*C, N).permute(1, 0, 2) -> unbatched (Cin, H=B, W=N),
    # flattened to (Cin, S) and cast to bf16 — one fused XLA relayout pass.
    xk = jnp.transpose(x.reshape(B, Cin, N), (1, 0, 2)).reshape(Cin, S)
    xk = xk.astype(jnp.bfloat16)

    # {0,1} validity masks for the +/-2 shifts along W (zero fill at row edges)
    col = jnp.arange(S, dtype=jnp.int32) % N
    m_r = (col < N - 2).astype(jnp.bfloat16).reshape(1, S)
    m_l = (col >= 2).astype(jnp.bfloat16).reshape(1, S)

    vmem = pl.BlockSpec(memory_space=pltpu.MemorySpace.VMEM)
    flops = 2 * S * (Chid * Cin + Cout * Chid)
    bytes_accessed = (Cin * S + Chid * Cin + Cout * Chid + 2 * S) * 2 \
        + (Chid + Cout) * 4 + Cout * S * 4
    # TODO(synk): for large B*N, tile the H (=B) axis with a +/-4-row halo grid
    # (recompute halo rows of the intermediate h per tile) so DMA overlaps compute
    # and the footprint fits v7x's 64 MiB VMEM.
    y = pl.pallas_call(
        functools.partial(scm_kernel, row_w=N),
        out_shape=jax.ShapeDtypeStruct((Cout, S), jnp.float32),
        in_specs=[vmem] * 7,
        out_specs=vmem,
        compiler_params=pltpu.CompilerParams(vmem_limit_bytes=64 * 1024 * 1024),
        cost_estimate=pl.CostEstimate(flops=flops, transcendentals=0,
                                      bytes_accessed=bytes_accessed),
    )(xk,
      w1.astype(jnp.bfloat16), b1.astype(jnp.float32).reshape(Chid, 1),
      w2.astype(jnp.bfloat16), b2.astype(jnp.float32).reshape(Cout, 1),
      m_r, m_l)

    # torch glue: y.reshape(B, n, C, N).permute(0, 1, 3, 2) — single output pass.
    return jnp.transpose(y.reshape(B, n, C, N), (0, 1, 3, 2))


# -------------------- pure-JAX reference (for validation) --------------------

def _dw_shift_weight(cin):
    g = cin // 5
    w = jnp.zeros((cin, 1, 5, 5), jnp.float32)
    w = w.at[0 * g:1 * g, 0, 2, 4].set(1.0)
    w = w.at[1 * g:2 * g, 0, 2, 0].set(1.0)
    w = w.at[2 * g:3 * g, 0, 4, 2].set(1.0)
    w = w.at[3 * g:4 * g, 0, 0, 2].set(1.0)
    w = w.at[4 * g:, 0, 2, 2].set(1.0)
    return w


def _shiftconv_ref(x_chw, w11, b11):
    cin = x_chw.shape[0]
    x4 = x_chw[None]
    y = lax.conv_general_dilated(x4, _dw_shift_weight(cin), (1, 1),
                                 ((2, 2), (2, 2)),
                                 dimension_numbers=("NCHW", "OIHW", "NCHW"),
                                 feature_group_count=cin)
    y = lax.conv_general_dilated(y, w11[:, :, None, None], (1, 1), "VALID",
                                 dimension_numbers=("NCHW", "OIHW", "NCHW"))
    return y[0] + b11[:, None, None]


def scm_reference(x, w1, b1, w2, b2):
    B, n, N, C = x.shape
    x_chw = jnp.transpose(x.reshape(B, n * C, N), (1, 0, 2))
    y = _shiftconv_ref(x_chw, w1, b1)
    y = jnp.maximum(y, 0.0)
    y = _shiftconv_ref(y, w2, b2)
    return jnp.transpose(y.reshape(B, n, C, N), (0, 1, 3, 2))


# ----------------------------------- main ------------------------------------

if __name__ == "__main__":
    # B=8, N=16 -> S = B*N = 128: lane-dense (full-vreg) stores, and the +/-2
    # row-shift path (H = B >= 5) is exercised.
    B, n, N, C = 8, 2, 16, 10
    exp_ratio = 4
    Cin = n * C                        # 20  (inp_channels of SCM)
    Cout = Cin                         # SCM's trailing reshape forces out_channels == n*C
    Chid = Cout * exp_ratio            # 80

    key = jax.random.PRNGKey(0)
    kx, k1, kb1, k2, kb2 = jax.random.split(key, 5)
    x = jax.random.normal(kx, (B, n, N, C), jnp.float32)
    # conv1x1 params of the two ShiftConv2d1 blocks (deterministic synthetic init)
    w1 = jax.random.normal(k1, (Chid, Cin), jnp.float32) * 0.1
    b1 = jax.random.normal(kb1, (Chid,), jnp.float32) * 0.1
    w2 = jax.random.normal(k2, (Cout, Chid), jnp.float32) * 0.1
    b2 = jax.random.normal(kb2, (Cout,), jnp.float32) * 0.1

    y = jax.block_until_ready(scm_forward(x, w1, b1, w2, b2))
    y_ref = jax.block_until_ready(scm_reference(x, w1, b1, w2, b2))

    assert y.shape == (B, n, N, C)
    # bf16 MXU operands -> tolerance loosened vs the pure-f32 reference conv
    max_err = float(jnp.max(jnp.abs(y - y_ref)))
    assert jnp.allclose(y, y_ref, atol=5e-2, rtol=5e-2), max_err
    print("KERNEL_OK")
</pallas_src>

<mosaic_0001>
module attributes {stable_mosaic.version = 11 : i64} {
  func.func @scm_kernel(%arg0: memref<20x128xbf16, #tpu.memory_space<vmem>>, %arg1: memref<80x20xbf16, #tpu.memory_space<vmem>>, %arg2: memref<80x1xf32, #tpu.memory_space<vmem>>, %arg3: memref<20x80xbf16, #tpu.memory_space<vmem>>, %arg4: memref<20x1xf32, #tpu.memory_space<vmem>>, %arg5: memref<1x128xbf16, #tpu.memory_space<vmem>>, %arg6: memref<1x128xbf16, #tpu.memory_space<vmem>>, %arg7: memref<20x128xf32, #tpu.memory_space<vmem>>) attributes {dimension_semantics = [], scalar_prefetch = 0 : i64, scratch_operands = 0 : i64, tpu.core_type = #tpu.core_type<tc>} {
    %c0 = arith.constant 0 : index
    %c0_0 = arith.constant 0 : index
    %0 = vector.load %arg5[%c0, %c0_0] : memref<1x128xbf16, #tpu.memory_space<vmem>>, vector<1x128xbf16>
    %c0_1 = arith.constant 0 : index
    %c0_2 = arith.constant 0 : index
    %1 = vector.load %arg6[%c0_1, %c0_2] : memref<1x128xbf16, #tpu.memory_space<vmem>>, vector<1x128xbf16>
    %c0_3 = arith.constant 0 : index
    %c0_4 = arith.constant 0 : index
    %2 = vector.load %arg0[%c0_3, %c0_4] : memref<20x128xbf16, #tpu.memory_space<vmem>>, vector<20x128xbf16>
    %cst = arith.constant 0.000000e+00 : bf16
    %3 = vector.broadcast %cst : bf16 to vector<4x2xbf16>
    %4 = vector.extract_strided_slice %2 {offsets = [0, 2], sizes = [4, 126], strides = [1, 1]} : vector<20x128xbf16> to vector<4x126xbf16>
    %5 = tpu.concatenate %4, %3 in 1 : vector<4x126xbf16>, vector<4x2xbf16> -> vector<4x128xbf16>
    %6 = vector.broadcast %0 : vector<1x128xbf16> to vector<4x128xbf16>
    %7 = arith.mulf %5, %6 : vector<4x128xbf16>
    %8 = vector.extract_strided_slice %2 {offsets = [4, 0], sizes = [4, 126], strides = [1, 1]} : vector<20x128xbf16> to vector<4x126xbf16>
    %9 = tpu.concatenate %3, %8 in 1 : vector<4x2xbf16>, vector<4x126xbf16> -> vector<4x128xbf16>
    %10 = vector.broadcast %1 : vector<1x128xbf16> to vector<4x128xbf16>
    %11 = arith.mulf %9, %10 : vector<4x128xbf16>
    %cst_5 = arith.constant 0.000000e+00 : bf16
    %12 = vector.broadcast %cst_5 : bf16 to vector<4x32xbf16>
    %13 = vector.extract_strided_slice %2 {offsets = [8, 32], sizes = [4, 96], strides = [1, 1]} : vector<20x128xbf16> to vector<4x96xbf16>
    %14 = tpu.concatenate %13, %12 in 1 : vector<4x96xbf16>, vector<4x32xbf16> -> vector<4x128xbf16>
    %15 = vector.extract_strided_slice %2 {offsets = [12, 0], sizes = [4, 96], strides = [1, 1]} : vector<20x128xbf16> to vector<4x96xbf16>
    %16 = tpu.concatenate %12, %15 in 1 : vector<4x32xbf16>, vector<4x96xbf16> -> vector<4x128xbf16>
    %17 = vector.extract_strided_slice %2 {offsets = [16, 0], sizes = [4, 128], strides = [1, 1]} : vector<20x128xbf16> to vector<4x128xbf16>
    %18 = tpu.concatenate %7, %11, %14, %16, %17 in 0 : vector<4x128xbf16>, vector<4x128xbf16>, vector<4x128xbf16>, vector<4x128xbf16>, vector<4x128xbf16> -> vector<20x128xbf16>
    %c0_6 = arith.constant 0 : index
    %c0_7 = arith.constant 0 : index
    %19 = vector.load %arg1[%c0_6, %c0_7] : memref<80x20xbf16, #tpu.memory_space<vmem>>, vector<80x20xbf16>
    %cst_8 = arith.constant dense<0.000000e+00> : vector<80x128xf32>
    %20 = tpu.matmul %19, %18, %cst_8 {dimension_numbers = #tpu.dot_dimension_numbers<[1], [0], [0], [1], [0, 0, 1, 1], [], []>} : vector<80x20xbf16>, vector<20x128xbf16>, vector<80x128xf32> -> vector<80x128xf32>
    %c0_9 = arith.constant 0 : index
    %c0_10 = arith.constant 0 : index
    %21 = vector.load %arg2[%c0_9, %c0_10] : memref<80x1xf32, #tpu.memory_space<vmem>>, vector<80x1xf32>
    %22 = vector.broadcast %21 : vector<80x1xf32> to vector<80x128xf32>
    %23 = arith.addf %20, %22 : vector<80x128xf32>
    %cst_11 = arith.constant 0.000000e+00 : f32
    %24 = vector.broadcast %cst_11 : f32 to vector<80x128xf32>
    %25 = arith.maximumf %23, %24 : vector<80x128xf32>
    %26 = arith.truncf %25 : vector<80x128xf32> to vector<80x128xbf16>
    %cst_12 = arith.constant 0.000000e+00 : bf16
    %27 = vector.broadcast %cst_12 : bf16 to vector<16x2xbf16>
    %28 = vector.extract_strided_slice %26 {offsets = [0, 2], sizes = [16, 126], strides = [1, 1]} : vector<80x128xbf16> to vector<16x126xbf16>
    %29 = tpu.concatenate %28, %27 in 1 : vector<16x126xbf16>, vector<16x2xbf16> -> vector<16x128xbf16>
    %30 = vector.broadcast %0 : vector<1x128xbf16> to vector<16x128xbf16>
    %31 = arith.mulf %29, %30 : vector<16x128xbf16>
    %32 = vector.extract_strided_slice %26 {offsets = [16, 0], sizes = [16, 126], strides = [1, 1]} : vector<80x128xbf16> to vector<16x126xbf16>
    %33 = tpu.concatenate %27, %32 in 1 : vector<16x2xbf16>, vector<16x126xbf16> -> vector<16x128xbf16>
    %34 = vector.broadcast %1 : vector<1x128xbf16> to vector<16x128xbf16>
    %35 = arith.mulf %33, %34 : vector<16x128xbf16>
    %cst_13 = arith.constant 0.000000e+00 : bf16
    %36 = vector.broadcast %cst_13 : bf16 to vector<16x32xbf16>
    %37 = vector.extract_strided_slice %26 {offsets = [32, 32], sizes = [16, 96], strides = [1, 1]} : vector<80x128xbf16> to vector<16x96xbf16>
    %38 = tpu.concatenate %37, %36 in 1 : vector<16x96xbf16>, vector<16x32xbf16> -> vector<16x128xbf16>
    %39 = vector.extract_strided_slice %26 {offsets = [48, 0], sizes = [16, 96], strides = [1, 1]} : vector<80x128xbf16> to vector<16x96xbf16>
    %40 = tpu.concatenate %36, %39 in 1 : vector<16x32xbf16>, vector<16x96xbf16> -> vector<16x128xbf16>
    %41 = vector.extract_strided_slice %26 {offsets = [64, 0], sizes = [16, 128], strides = [1, 1]} : vector<80x128xbf16> to vector<16x128xbf16>
    %42 = tpu.concatenate %31, %35, %38, %40, %41 in 0 : vector<16x128xbf16>, vector<16x128xbf16>, vector<16x128xbf16>, vector<16x128xbf16>, vector<16x128xbf16> -> vector<80x128xbf16>
    %c0_14 = arith.constant 0 : index
    %c0_15 = arith.constant 0 : index
    %43 = vector.load %arg3[%c0_14, %c0_15] : memref<20x80xbf16, #tpu.memory_space<vmem>>, vector<20x80xbf16>
    %cst_16 = arith.constant dense<0.000000e+00> : vector<20x128xf32>
    %44 = tpu.matmul %43, %42, %cst_16 {dimension_numbers = #tpu.dot_dimension_numbers<[1], [0], [0], [1], [0, 0, 1, 1], [], []>} : vector<20x80xbf16>, vector<80x128xbf16>, vector<20x128xf32> -> vector<20x128xf32>
    %c0_17 = arith.constant 0 : index
    %c0_18 = arith.constant 0 : index
    %45 = vector.load %arg4[%c0_17, %c0_18] : memref<20x1xf32, #tpu.memory_space<vmem>>, vector<20x1xf32>
    %46 = vector.broadcast %45 : vector<20x1xf32> to vector<20x128xf32>
    %47 = arith.addf %44, %46 : vector<20x128xf32>
    %c0_19 = arith.constant 0 : index
    %c0_20 = arith.constant 0 : index
    %48 = vector.load %arg7[%c0_19, %c0_20] : memref<20x128xf32, #tpu.memory_space<vmem>>, vector<20x128xf32>
    tpu.vector_store %arg7[%c0_19, %c0_20], %47 {strides = array<i32>} : memref<20x128xf32, #tpu.memory_space<vmem>>, vector<20x128xf32>,
    return
  }
}

</mosaic_0001>

<bundles_post_ra>
// kernel: tpu_custom_call.1
= control target key start
LH: loop header
LB: loop body
LE: loop exit
PB: predicated region body
PF: predicated region fallthrough
CT: control target
= control target key end

     0   :  { %s652_s0 = inlined_call_operand.vmem [shape: bf16[20,128], index: 0, kind: input, shape index: {}]   ;;  %s653_s1 = inlined_call_operand.vmem [shape: bf16[80,20], index: 1, kind: input, shape index: {}]   ;;  %s654_s2 = inlined_call_operand.vmem [shape: f32[80,1], index: 2, kind: input, shape index: {}]   ;;  %s655_s3 = inlined_call_operand.vmem [shape: bf16[20,80], index: 3, kind: input, shape index: {}]   ;;  %s656_s4 = inlined_call_operand.vmem [shape: f32[20,1], index: 4, kind: input, shape index: {}]   ;;  %s657_s5 = inlined_call_operand.vmem [shape: bf16[1,128], index: 5, kind: input, shape index: {}]   ;;  %s658_s6 = inlined_call_operand.vmem [shape: bf16[1,128], index: 6, kind: input, shape index: {}]   ;;  %s659_s7 = inlined_call_operand.hbm [shape: f32[20,128], index: 7, kind: output, shape index: {}]  }
   0x1   :  { %v452_v0 = vld [vmem:[%s652_s0] sm:$0xff]  }
   0x2   :  { %12 = vsyncpa [#allocation3], 0  ;;  %v453_v1 = vunpack.c.l.b16 %v452_v0  ;;  %v454_v2 = vunpack.c.h.b16 %v452_v0  ;;  %s501_s26 = smov 96   ;;  %s502_s27 = smov 2   ;;  %v32_v7 = vld [vmem:[%s652_s0 + $0x8] sm:$0x3] }
   0x3   :  { %s503_s28 = smov 32   ;;  %s504_s29 = smov 126   ;;  %vm88_vm0 = vcmask 1041408   ;;  %v29_v9 = vld [vmem:[%s658_s6] sm:$0x1]  ;;  %v111_v10 = vld [vmem:[%s654_s2 + $0x10] sm:$0xff] }
   0x4   :  { %v35_v3 = vpack.c.b16 %v453_v1, %v453_v1  ;;  %v68_v4 = vpack.c.b16 %v454_v2, %v454_v2  ;;  %v211_v8 = vsel %vm88_vm0, %v32_v7, 0  ;;  %v116_v11 = vld [vmem:[%s654_s2 + $0x38] sm:$0xff]  ;;  %v59_v12 = vpack.i.b16 %v29_v9, %v29_v9  ;;  %v28_v15 = vld [vmem:[%s657_s5] sm:$0x1]  ;;  %v115_v25 = vld [vmem:[%s654_s2 + $0x30] sm:$0xff]  ;;  %s506_s21 = smov [#allocation2]  }
   0x5   :  { %219 = vmatpush.bf16.msra.mxu0 %v211_v8  ;;  %455 = vmatpush.bf16.msra.mxu2 %v211_v8  ;;  %v505_v13 = vmov 0   ;;  %vm54_vm1 = vcmask 15360   ;;  %v44_v19 = vpack.i.b16 %v28_v15, %v28_v15  ;;  %vm38_vm2 = vcmask 1031168   ;;  %v112_v26 = vld [vmem:[%s654_s2 + $0x18] sm:$0xff]  ;;  %v110_v27 = vld [vmem:[%s654_s2 + $0x8] sm:$0xff]  ;;  %v109_v39 = vld [vmem:[%s654_s2] sm:$0xff] }
   0x6   :  { %v51_v5 = vrot.slane %v35_v3, 2  ;;  %69 = vrot.lane.b32.xlu1 %v68_v4, %s501_s26  ;;  %v74_v6 = vrot.slane %v68_v4, 2  ;;  %456 = vmatpush.bf16.msra.mxu3 %v211_v8  ;;  %v61_v14 = vperm.slane %v59_v12, 0  ;;  %vm77_vm3 = vcmask 261120   ;;  %v114_v38 = vld [vmem:[%s654_s2 + $0x28] sm:$0xff]  ;;  %v117_v43 = vld [vmem:[%s654_s2 + $0x40] sm:$0xff] }
   0x7   :  { %474 = vset.pattern.permute.xlu1 %v505_v13  ;;  %472 = vset.pattern.permute.xlu2 %v505_v13  ;;  %v46_v23 = vperm.slane %v44_v19, 0  ;;  %vm71_vm4 = vcmask 785408   ;;  %vm92_vm5 = vcmask 1043456   ;;  %vm95_vm6 = vcmask 1045504   ;;  %v445_v48 = vld [vmem:[%s653_s1] sm:$0xff]  ;;  %v447_v49 = vld [vmem:[%s653_s1 + $0x10] sm:$0xff]  ;;  %vm441_vm8 = vmneg %vm77_vm3 }
   0x8   :  { %52 = vrot.lane.b32.xlu0 %v51_v5, %s502_s27  ;;  %131 = vperm.xlu2 %472, %v111_v10   ;;  %v572_v18 = vunpack.c.l.bf16 %v61_v14  ;;  %vm194_vm7 = vcmask 162816   ;;  %v448_v50 = vld [vmem:[%s653_s1 + $0x18] sm:$0xff]  ;;  %v113_v51 = vld [vmem:[%s654_s2 + $0x20] sm:$0xff]  ;;  %v118_v52 = vld [vmem:[%s654_s2 + $0x48] sm:$0xff]  ;;  %vm366_vm9 = vcmask 654336   ;;  %s398_s22 = sshll.u32 %s506_s21, 4  ;;  %s399_s22 = int_to_ptr.vmem [resolvable:$true] %s398_s22 }
   0x9   :  { %473 = vset.pattern.permute.xlu0 %v505_v13  ;;  %v585_v30 = vunpack.c.l.bf16 %v46_v23  ;;  %v446_v53 = vld [vmem:[%s653_s1 + $0x8] sm:$0xff]  ;;  %v449_v54 = vld [vmem:[%s653_s1 + $0x20] sm:$0xff]  ;;  %s400_s25 = sshll.u32 %s659_s7, 4  ;;  %s508_s30 = smov 8   ;;  %s401_s25 = int_to_ptr.hbm [resolvable:$true] %s400_s25 }
   0xe   :  { %75 = vrot.lane.b32.xlu1 %v74_v6, %s503_s28 }
  0x10   :  { %36 = vrot.lane.b32.xlu0 %v35_v3, %s504_s29  ;;  %136 = vperm.xlu2 %472, %v112_v26  }
  0x16   :  { %156 = vperm.xlu1 %474, %v116_v11  }
  0x18   :  { %151 = vperm.xlu0 %473, %v115_v25   ;;  %121 = vperm.xlu2 %472, %v109_v39  }
  0x1e   :  { %126 = vperm.xlu1 %474, %v110_v27  }
  0x20   :  { %146 = vperm.xlu0 %473, %v114_v38   ;;  %141 = vperm.xlu2 %472, %v113_v51  }
  0x26   :  { %161 = vperm.xlu1 %474, %v117_v43  }
  0x28   :  { %166 = vperm.xlu2 %472, %v118_v52  }
  0x62   :  { %v132_v55 = vpop.permute.xlu2 %131 }
  0x6a   :  { %v137_v56 = vpop.permute.xlu2 %136 }
  0x72   :  { %v122_v59 = vpop.permute.xlu2 %121 }
  0x78   :  { %v70_v16 = vpop.permute.xlu1 %69 }
  0x79   :  { %v73_v36 = vsel %vm71_vm4, %v70_v16, 0 }
  0x7a   :  { %v53_v17 = vpop.permute.xlu0 %52  ;;  %v85_v44 = vrot.slane %v73_v36, 4 }
  0x7b   :  { %v56_v20 = vsel %vm54_vm1, 0, %v53_v17 }
  0x7c   :  { %v62_v21 = vunpack.c.l.bf16 %v56_v20 }
  0x7e   :  { %v64_v22 = vmul.f32 %v572_v18, %v62_v21  ;;  %v142_v21 = vpop.permute.xlu2 %141 }
  0x80   :  { %v65_v24 = vpack.c.bf16 %v64_v22, %v64_v22  ;;  %v76_v31 = vpop.permute.xlu1 %75 }
  0x81   :  { %v79_v35 = vsel %vm77_vm3, 0, %v76_v31  ;;  %v341_v31 = vld [vmem:[%s656_s4 + $0x8] sm:$0xff] }
  0x82   :  { %v81_v28 = vunpack.c.l.b16 %v65_v24  ;;  %v37_v29 = vpop.permute.xlu0 %36  ;;  %v87_v42 = vrot.slane %v79_v35, 2 }
  0x83   :  { %v41_v32 = vsel %vm38_vm2, %v37_v29, 0 }
  0x84   :  { %v82_v33 = vpack.c.b16 %v81_v28, %v81_v28  ;;  %v47_v34 = vunpack.c.l.bf16 %v41_v32 }
  0x86   :  { %v49_v37 = vmul.f32 %v585_v30, %v47_v34  ;;  %v83_v40 = vrot.slane %v82_v33, 6 }
  0x88   :  { %v50_v41 = vpack.c.bf16 %v49_v37, %v49_v37  ;;  %v157_v57 = vpop.permute.xlu1 %156 }
  0x8a   :  { %v91_v45 = vsel %vm88_vm0, %v50_v41, %v83_v40  ;;  %v152_v63 = vpop.permute.xlu0 %151 }
  0x8b   :  { %v94_v46 = vsel %vm92_vm5, %v91_v45, %v85_v44 }
  0x8c   :  { %v97_v47 = vsel %vm95_vm6, %v94_v46, %v87_v42  ;;  %v167_v42 = vpop.permute.xlu2 %166  ;;  %v340_v46 = vld [vmem:[%s656_s4] sm:$0xff] }
  0x8d   :  { %220 = vmatpush.bf16.msra.mxu0 %v97_v47  ;;  %457 = vmatpush.bf16.msra.mxu2 %v97_v47 }
  0x8e   :  { %458 = vmatpush.bf16.msra.mxu3 %v97_v47 }
  0x90   :  { %432 = vmatmul.msk.bf16.vlgmr.msra.gmra.mxu0 %vm194_vm7, %v445_v48  ;;  %434 = vmatmul.msk.bf16.vlgmr.msra.gmra.mxu2 %vm194_vm7, %v447_v49  ;;  %v127_v61 = vpop.permute.xlu1 %126 }
  0x91   :  { %435 = vmatmul.msk.bf16.vlgmr.msra.gmra.mxu3 %vm194_vm7, %v448_v50 }
  0x92   :  { %v147_v23 = vpop.permute.xlu0 %146 }
  0x98   :  { %v162_v22 = vpop.permute.xlu1 %161 }
  0xa0   :  { %433 = vmatmul.msk.bf16.gmra.mxu0 %vm194_vm7, %v446_v53 }
  0xa1   :  { %436 = vmatmul.msk.bf16.gmra.mxu3 %vm194_vm7, %v449_v54 }
 0x10d   :  { %v222_v58 = vpop.f32.mrf.mxu0 }
 0x10e   :  { %v223_v60 = vadd.f32 %v222_v58, %v122_v59 }
 0x110   :  { %v247_v62 = vmax.f32 %v223_v60, 0.0  ;;  %v342_v60 = vld [vmem:[%s656_s4 + $0x10] sm:$0xf] }
 0x112   :  { %v257_v4 = vpack.c.bf16 %v247_v62, %v247_v62 }
 0x113   :  { %v232_v6 = vpop.f32.mrf.mxu2 }
 0x114   :  { %v237_v0 = vpop.f32.mrf.mxu3  ;;  %v269_v9 = vunpack.c.l.b16 %v257_v4  ;;  %v233_v35 = vadd.f32 %v232_v6, %v142_v21 }
 0x115   :  { %v238_v1 = vadd.f32 %v237_v0, %v152_v63  ;;  %v224_v2 = vpop.f32.mrf.mxu0 }
 0x116   :  { %v225_v3 = vadd.f32 %v224_v2, %v127_v61  ;;  %v251_v41 = vmax.f32 %v233_v35, 0.0 }
 0x117   :  { %v253_v7 = vmax.f32 %v238_v1, 0.0 }
 0x118   :  { %v248_v5 = vmax.f32 %v225_v3, 0.0  ;;  %v261_v52 = vpack.c.bf16 %v251_v41, %v251_v41 }
 0x119   :  { %v263_v12 = vpack.c.bf16 %v253_v7, %v253_v7 }
 0x11a   :  { %v258_v8 = vpack.c.bf16 %v248_v5, %v248_v5 }
 0x11b   :  { %v311_v19 = vunpack.c.l.b16 %v263_v12  ;;  %v234_v24 = vpop.f32.mrf.mxu2 }
 0x11c   :  { %v270_v10 = vunpack.c.l.b16 %v258_v8  ;;  %v239_v11 = vpop.f32.mrf.mxu3  ;;  %v235_v33 = vadd.f32 %v234_v24, %v147_v23  ;;  %v450_v23 = vld [vmem:[%s655_s3] sm:$0xff] }
 0x11d   :  { %v240_v13 = vadd.f32 %v239_v11, %v157_v57  ;;  %v227_v14 = vpop.f32.mrf.mxu0  ;;  %v301_v57 = vunpack.c.l.b16 %v261_v52 }
 0x11e   :  { %v271_v15 = vpack.c.b16 %v270_v10, %v269_v9  ;;  %v228_v17 = vadd.f32 %v227_v14, %v132_v55  ;;  %v252_v39 = vmax.f32 %v235_v33, 0.0 }
 0x11f   :  { %v254_v16 = vmax.f32 %v240_v13, 0.0 }
 0x120   :  { %272 = vrot.lane.b32.xlu2 %v271_v15, %s504_s29  ;;  %v249_v26 = vmax.f32 %v228_v17, 0.0  ;;  %v262_v49 = vpack.c.bf16 %v252_v39, %v252_v39 }
 0x121   :  { %v264_v20 = vpack.c.bf16 %v254_v16, %v254_v16 }
 0x122   :  { %v259_v36 = vpack.c.bf16 %v249_v26, %v249_v26  ;;  %v302_v55 = vunpack.c.l.b16 %v262_v49 }
 0x123   :  { %v312_v25 = vunpack.c.l.b16 %v264_v20 }
 0x124   :  { %v242_v27 = vpop.f32.mrf.mxu3  ;;  %v285_v43 = vunpack.c.l.b16 %v259_v36  ;;  %v303_v59 = vpack.c.b16 %v302_v55, %v301_v57 }
 0x125   :  { %v229_v28 = vpop.f32.mrf.mxu0  ;;  %v313_v29 = vpack.c.b16 %v312_v25, %v311_v19  ;;  %v243_v32 = vadd.f32 %v242_v27, %v162_v22  ;;  %v339_v19 = vld [vmem:[%s655_s3 + $0x8] sm:$0x3]  ;;  %s507_s3 = smov 128  }
 0x126   :  { %v230_v34 = vadd.f32 %v229_v28, %v137_v56  ;;  %v363_v22 = vunpack.c.l.b16 %v339_v19 }
 0x127   :  { %314 = vrot.lane.b32.xlu1 %v313_v29, %s503_s28  ;;  %v255_v38 = vmax.f32 %v243_v32, 0.0 }
 0x128   :  { %v250_v37 = vmax.f32 %v230_v34, 0.0  ;;  %350 = vperm.xlu2 %472, %v341_v31   ;;  %v365_v24 = vpack.c.b16 %v363_v22, %v363_v22 }
 0x129   :  { %v265_v47 = vpack.c.bf16 %v255_v38, %v255_v38 }
 0x12a   :  { %v260_v40 = vpack.c.bf16 %v250_v37, %v250_v37 }
 0x12b   :  { %v333_v53 = vunpack.c.l.b16 %v265_v47 }
 0x12c   :  { %v286_v44 = vunpack.c.l.b16 %v260_v40  ;;  %v244_v45 = vpop.f32.mrf.mxu3 }
 0x12d   :  { %v245_v48 = vadd.f32 %v244_v45, %v167_v42 }
 0x12e   :  { %v287_v50 = vpack.c.b16 %v286_v44, %v285_v43 }
 0x12f   :  { %v256_v51 = vmax.f32 %v245_v48, 0.0  ;;  %345 = vperm.xlu1 %474, %v340_v46  }
 0x130   :  { %288 = vrot.lane.b32.xlu0 %v287_v50, %s502_s27 }
 0x131   :  { %v266_v54 = vpack.c.bf16 %v256_v51, %v256_v51 }
 0x133   :  { %v334_v56 = vunpack.c.l.b16 %v266_v54 }
 0x135   :  { %v335_v58 = vpack.c.b16 %v334_v56, %v333_v53 }
 0x137   :  { %376 = vmatpush.bf16.msra.mxu1 %v335_v58  ;;  %459 = vmatpush.bf16.msrb.mxu2 %v335_v58 }
 0x138   :  { %304 = vrot.lane.b32.xlu0 %v303_v59, %s501_s26 }
 0x140   :  { %355 = vperm.xlu0 %473, %v342_v60  }
 0x17a   :  { %v273_v62 = vpop.permute.xlu2 %272 }
 0x17b   :  { %v275_v63 = vsel %vm38_vm2, %v273_v62, 0 }
 0x17c   :  { %v277_v0 = vunpack.c.l.bf16 %v275_v63  ;;  %v278_v1 = vunpack.c.h.bf16 %v275_v63 }
 0x17e   :  { %v279_v6 = vmul.f32 %v277_v0, %v585_v30  ;;  %v280_v7 = vmul.f32 %v278_v1, %v585_v30 }
 0x180   :  { %v281_v15 = vpack.c.bf16 %v279_v6, %v279_v6  ;;  %v282_v16 = vpack.c.bf16 %v280_v7, %v280_v7 }
 0x182   :  { %v321_v20 = vunpack.c.l.b16 %v281_v15  ;;  %v322_v21 = vunpack.c.l.b16 %v282_v16  ;;  %v351_v32 = vpop.permute.xlu2 %350 }
 0x199   :  { %v315_v61 = vpop.permute.xlu1 %314 }
 0x19a   :  { %442 = vmatpush.bf16.msk.msra.mxu1 %vm441_vm8, %v315_v61  ;;  %460 = vmatpush.bf16.msk.msrb.mxu2 %vm441_vm8, %v315_v61 }
 0x1a1   :  { %v346_v25 = vpop.permute.xlu1 %345 }
 0x1a2   :  { %v289_v2 = vpop.permute.xlu0 %288 }
 0x1a3   :  { %v291_v3 = vsel %vm54_vm1, 0, %v289_v2 }
 0x1a4   :  { %v293_v4 = vunpack.c.l.bf16 %v291_v3  ;;  %v294_v5 = vunpack.c.h.bf16 %v291_v3 }
 0x1a6   :  { %v295_v8 = vmul.f32 %v293_v4, %v572_v18  ;;  %v296_v9 = vmul.f32 %v294_v5, %v572_v18  ;;  %v323_v18 = vpack.c.b16 %v322_v21, %v321_v20 }
 0x1a8   :  { %v297_v10 = vpack.c.bf16 %v295_v8, %v295_v8  ;;  %v298_v11 = vpack.c.bf16 %v296_v9, %v296_v9 }
 0x1aa   :  { %v305_v12 = vpop.permute.xlu0 %304  ;;  %v327_v13 = vunpack.c.l.b16 %v297_v10  ;;  %v328_v14 = vunpack.c.l.b16 %v298_v11 }
 0x1ab   :  { %v307_v17 = vsel %vm71_vm4, %v305_v12, 0 }
 0x1ac   :  { %378 = vmatpush.bf16.msra.mxu1 %v307_v17  ;;  %461 = vmatpush.bf16.msrb.mxu2 %v307_v17  ;;  %v329_v30 = vpack.c.b16 %v328_v14, %v327_v13 }
 0x1b0   :  { %379 = vmatpush.bf16.msra.mxu1 %v329_v30  ;;  %462 = vmatpush.bf16.msrb.mxu2 %v329_v30 }
 0x1b2   :  { %v356_v28 = vpop.permute.xlu0 %355 }
 0x1b4   :  { %380 = vmatpush.bf16.msra.mxu1 %v323_v18  ;;  %463 = vmatpush.bf16.msrb.mxu2 %v323_v18 }
 0x1b7   :  { %443 = vmatmul.msk.bf16.vlgmr.msra.gmra.mxu1 %vm366_vm9, %v450_v23  ;;  %444 = vmatmul.msk.bf16.vlgmr.msrb.gmra.mxu2 %vm366_vm9, %v365_v24 }
 0x234   :  { %v382_v26 = vpop.f32.mrf.mxu1 }
 0x235   :  { %v383_v27 = vadd.f32 %v382_v26, %v346_v25 }
 0x237   :  { %391 = vst [vmem:[#allocation2] sm:$0xff] %v383_v27 }
 0x23a   :  { %v387_v29 = vpop.f32.mrf.mxu2 }
 0x23b   :  { %v388_v31 = vadd.f32 %v387_v29, %v356_v28 }
 0x23c   :  { %v384_v33 = vpop.f32.mrf.mxu1 }
 0x23d   :  { %393 = vst [vmem:[#allocation2 + $0x10] sm:$0xf] %v388_v31  ;;  %v385_v34 = vadd.f32 %v384_v33, %v351_v32 }
 0x23f   :  { %392 = vst [vmem:[#allocation2 + $0x8] sm:$0xff] %v385_v34 }
 0x240   :  { %406 = dma.vmem_to_hbm [thread:$0]  %s399_s22, 384, %s401_s25, [#allocation3], %s507_s3, %s507_s3, %s508_s30  }
 0x242   :  { %v389_v35 = vpop.f32.mrf.mxu2 }
 0x243   :  { %499 = dma.done.wait [#allocation3], 384  }
 0x244   :  { %500 = vsyncadd [#allocation3], 4294966912 }
 0x245   :  { %411 = vsyncpa [#allocation3], 1 }

</bundles_post_ra>
